<compile_context>
chip_gen: v6e
topology: v6e:2x2x1
jax: 0.10.0
libtpu: 0.0.40
codegen_flags: <defaults>
</compile_context>

<pallas_src>
import functools

import numpy as np
import jax
import jax.numpy as jnp
from jax import lax
from jax.experimental import pallas as pl
from jax.experimental.pallas import tpu as pltpu


# ---------------- diffusion schedule (buffers, as in the PyTorch __init__) -----------
TIMESTEPS = 1000
# NOTE: beta_end = 0.2 intentionally matches the reference code
# (torch.linspace(0.0001, 0.2, timesteps)), not the more common 0.02.
_betas = np.linspace(0.0001, 0.2, TIMESTEPS, dtype=np.float64)
_alphas = 1.0 - _betas
_alphas_bar = np.cumprod(_alphas, axis=0)
SQRT_ALPHAS_BAR = jnp.asarray(np.sqrt(_alphas_bar), dtype=jnp.float32)           # [T]
SQRT_1M_ALPHAS_BAR = jnp.asarray(np.sqrt(1.0 - _alphas_bar), dtype=jnp.float32)  # [T]


# ---------------- synthetic noise-prediction model parameters ------------------------
# model(x_t, t)[b, c, n] = sum_c' W[c, c'] * x_t[b, c', n] + bias[c] + temb[t[b], c]
def make_model_params(channels, timesteps):
    kw, kb = jax.random.split(jax.random.PRNGKey(42))
    W = (jax.random.normal(kw, (channels, channels), dtype=jnp.float32) * 0.1
         + jnp.eye(channels, dtype=jnp.float32))
    bias = jax.random.normal(kb, (channels,), dtype=jnp.float32) * 0.01
    t_idx = jnp.arange(timesteps, dtype=jnp.float32)[:, None]
    c_idx = jnp.arange(channels, dtype=jnp.float32)[None, :]
    temb_table = jnp.sin(t_idx / (1000.0 ** (c_idx / channels))) * 0.05
    return W, bias, temb_table


# ---------------- tiling helpers ------------------------------------------------------
def _pick_tn(n_pad, cap_lanes=2048):
    """Largest multiple-of-128 divisor of n_pad that is <= cap_lanes (n_pad % 128 == 0)."""
    best = 128
    d = 128
    while d <= min(n_pad, cap_lanes):
        if n_pad % d == 0:
            best = d
        d += 128
    return best


def _pick_tb(bs, C, tn, target_bytes=1 << 20, max_bytes=2 << 20):
    """Batches per block: TB*C a multiple of 8, TB | bs, block bytes ~1-2 MiB.

    Prefers keeping >= 2 batch tiles (v7x has 2 TensorCores to shard the 'parallel'
    axis over) unless that would shrink blocks well below the byte target.
    """
    cands = [tb for tb in range(1, bs + 1)
             if bs % tb == 0 and (tb * C) % 8 == 0]
    if not cands:
        return bs  # fall back: full row dim in one block (block == full array dims)
    row_bytes = C * tn * 4
    ok = [tb for tb in cands if tb * row_bytes <= max_bytes] or [cands[0]]
    best = max(ok)
    multi = [tb for tb in ok if bs // tb >= 2]
    if multi:
        mbest = max(multi)
        if mbest * row_bytes * 2 >= min(best * row_bytes, target_bytes):
            best = mbest
    return best


# ---------------- Pallas kernel --------------------------------------------------------
def _diffusion_loss_kernel(x0_ref, noise_ref, sa_ref, s1m_ref, temb_ref, wblk_ref,
                           out_ref, *, n_valid, out_rows):
    """One (R, tn) block: q(x_t|x_0), synthetic model, fused squared error, partial sum.

    out_ref is an (out_rows, 128) lane-dense accumulator, resident across the point
    (j / 'arbitrary') grid axis; initialized at j == 0.
    """
    j = pl.program_id(1)

    x0 = x0_ref[...]                         # (R, tn) f32
    noise = noise_ref[...]                   # (R, tn) f32
    R, tn = x0.shape

    # forward diffusion q(x_t | x_0); schedule columns broadcast along lanes
    x_t = s1m_ref[...] * noise + sa_ref[...] * x0

    # synthetic model on the MXU (block-diagonal 1x1 channel mix), fused with the
    # epilogue:  err = pred - noise = Wblk @ x_t + (temb + bias - noise)
    err = (jnp.dot(wblk_ref[...], x_t, preferred_element_type=jnp.float32)
           + (temb_ref[...] - noise))

    if n_valid is not None:                  # lane padding present: mask padded lanes
        lane = lax.broadcasted_iota(jnp.int32, (R, tn), 1) + j * tn
        err = jnp.where(lane < n_valid, err, 0.0)

    err2 = err * err

    # hierarchical, tile-aligned reduction to a dense (out_rows, 128) partial
    acc = err2[:, 0:128]
    for g in range(1, tn // 128):            # fold lane groups (static slices)
        acc = acc + err2[:, g * 128:(g + 1) * 128]

    if out_rows == 8:                        # R is a multiple of 8: fold sublane groups
        part = acc[0:8, :]
        for s in range(1, R // 8):
            part = part + acc[s * 8:(s + 1) * 8, :]
    else:                                    # ragged-row fallback (single batch tile)
        part = jnp.sum(acc, axis=0, keepdims=True)

    @pl.when(j == 0)
    def _():
        out_ref[...] = jnp.zeros_like(out_ref)

    out_ref[...] += part


# ---------------- wrappers -------------------------------------------------------------
def noise_pred_loss_pallas(x0, noise, sa, s1m, temb_b, W):
    """x0, noise: [bs, C, N]; sa, s1m: [bs]; temb_b: [bs, C] (already includes bias)."""
    bs, C, N = x0.shape

    # dense 2-D lane-tileable views, zero-padded so the lane dim is a multiple of 128
    N_pad = ((N + 127) // 128) * 128
    x0_2d = x0.reshape(bs * C, N)
    nz_2d = noise.reshape(bs * C, N)
    if N_pad != N:
        pad = ((0, 0), (0, N_pad - N))
        x0_2d = jnp.pad(x0_2d, pad)
        nz_2d = jnp.pad(nz_2d, pad)

    tn = _pick_tn(N_pad)
    TB = _pick_tb(bs, C, tn)
    R = TB * C
    n_bi = (bs * C) // R
    n_nj = N_pad // tn
    out_rows = 8 if R % 8 == 0 else 1

    # per-row schedule / embedding columns and block-diagonal channel-mix weights
    sa_rows = jnp.repeat(sa, C).reshape(bs * C, 1).astype(jnp.float32)
    s1m_rows = jnp.repeat(s1m, C).reshape(bs * C, 1).astype(jnp.float32)
    temb_rows = temb_b.reshape(bs * C, 1).astype(jnp.float32)
    wblk = jnp.kron(jnp.eye(TB, dtype=jnp.float32), W.astype(jnp.float32))   # (R, R)

    kernel = functools.partial(_diffusion_loss_kernel,
                               n_valid=(N if N_pad != N else None),
                               out_rows=out_rows)

    partials = pl.pallas_call(
        kernel,
        out_shape=jax.ShapeDtypeStruct((n_bi * out_rows, 128), jnp.float32),
        grid_spec=pltpu.PrefetchScalarGridSpec(
            num_scalar_prefetch=0,
            grid=(n_bi, n_nj),
            in_specs=[
                pl.BlockSpec((R, tn), lambda i, j: (i, j)),     # x_0        (bs*C, N_pad)
                pl.BlockSpec((R, tn), lambda i, j: (i, j)),     # noise      (bs*C, N_pad)
                pl.BlockSpec((R, 1), lambda i, j: (i, 0)),      # sqrt(abar) rows
                pl.BlockSpec((R, 1), lambda i, j: (i, 0)),      # sqrt(1-abar) rows
                pl.BlockSpec((R, 1), lambda i, j: (i, 0)),      # temb + bias rows
                pl.BlockSpec((R, R), lambda i, j: (0, 0)),      # kron(I_TB, W)
            ],
            out_specs=pl.BlockSpec((out_rows, 128), lambda i, j: (i, 0)),
        ),
        compiler_params=pltpu.CompilerParams(
            dimension_semantics=("parallel", "arbitrary"),      # j is the reduction axis
            vmem_limit_bytes=32 * 1024 * 1024),                 # safe on v7x (64 MiB VMEM)
    )(x0_2d, nz_2d, sa_rows, s1m_rows, temb_rows, wblk)

    # F.mse_loss: mean over the true (unpadded) element count
    return jnp.sum(partials) / jnp.float32(bs * C * N)


def gaussian_diffusion_forward(img, key, W, bias, temb_table):
    """img: [bs, C, N] float32 -> scalar noise-prediction MSE loss (PyTorch forward)."""
    bs, C, N = img.shape
    k_t, k_noise = jax.random.split(key)

    t = jax.random.randint(k_t, (bs,), 0, TIMESTEPS)                 # random timesteps
    sa = jnp.take(SQRT_ALPHAS_BAR, t)                                # extract(...)
    s1m = jnp.take(SQRT_1M_ALPHAS_BAR, t)
    temb_b = jnp.take(temb_table, t, axis=0) + bias[None, :]         # (bs, C)
    noise = jax.random.normal(k_noise, (bs, C, N), dtype=jnp.float32)

    return noise_pred_loss_pallas(img, noise, sa, s1m, temb_b, W)


# ---------------- pure-JAX reference (for the self-check) ------------------------------
def _noise_pred_loss_ref(x0, noise, sa, s1m, temb_b, W):
    x_t = s1m[:, None, None] * noise + sa[:, None, None] * x0
    pred = jnp.einsum('cd,bdn->bcn', W, x_t) + temb_b[:, :, None]
    return jnp.mean((pred - noise) ** 2)


if __name__ == "__main__":
    bs, C, N = 2, 4, 128          # [bs, pnt_channel, n_skh_pnt]
    key = jax.random.PRNGKey(0)
    k_img, k_fwd = jax.random.split(key)

    img = jax.random.normal(k_img, (bs, C, N), dtype=jnp.float32)
    W, bias, temb_table = make_model_params(C, TIMESTEPS)

    # full forward pass (random t + random noise, like the PyTorch module)
    loss = gaussian_diffusion_forward(img, k_fwd, W, bias, temb_table)
    jax.block_until_ready(loss)
    assert loss.shape == ()
    assert bool(jnp.isfinite(loss)) and float(loss) >= 0.0

    # deterministic correctness check of the kernel against a pure-JAX reference
    kt, kn = jax.random.split(jax.random.PRNGKey(1))
    t = jax.random.randint(kt, (bs,), 0, TIMESTEPS)
    noise = jax.random.normal(kn, (bs, C, N), dtype=jnp.float32)
    sa = jnp.take(SQRT_ALPHAS_BAR, t)
    s1m = jnp.take(SQRT_1M_ALPHAS_BAR, t)
    temb_b = jnp.take(temb_table, t, axis=0) + bias[None, :]

    got = noise_pred_loss_pallas(img, noise, sa, s1m, temb_b, W)
    want = _noise_pred_loss_ref(img, noise, sa, s1m, temb_b, W)
    jax.block_until_ready((got, want))
    np.testing.assert_allclose(np.asarray(got), np.asarray(want), rtol=1e-5, atol=1e-6)

    print("KERNEL_OK")
</pallas_src>

<mosaic_0001>
module attributes {stable_mosaic.version = 11 : i64} {
  func.func @_diffusion_loss_kernel(%arg0: i32, %arg1: i32, %arg2: memref<8x128xf32, #tpu.memory_space<vmem>>, %arg3: memref<8x128xf32, #tpu.memory_space<vmem>>, %arg4: memref<8x1xf32, #tpu.memory_space<vmem>>, %arg5: memref<8x1xf32, #tpu.memory_space<vmem>>, %arg6: memref<8x1xf32, #tpu.memory_space<vmem>>, %arg7: memref<8x8xf32, #tpu.memory_space<vmem>>, %arg8: memref<8x128xf32, #tpu.memory_space<vmem>>) attributes {dimension_semantics = [#tpu.dimension_semantics<parallel>, #tpu.dimension_semantics<arbitrary>], iteration_bounds = array<i64: 1, 1>, scalar_prefetch = 0 : i64, scratch_operands = 0 : i64, tpu.core_type = #tpu.core_type<tc>, window_params = [{transform_indices = @transform_0, window_bounds = array<i64: 8, 128>}, {transform_indices = @transform_1, window_bounds = array<i64: 8, 128>}, {transform_indices = @transform_2, window_bounds = array<i64: 8, 1>}, {transform_indices = @transform_3, window_bounds = array<i64: 8, 1>}, {transform_indices = @transform_4, window_bounds = array<i64: 8, 1>}, {pipeline_mode = #tpu.pipeline_mode<synchronous>, transform_indices = @transform_5, window_bounds = array<i64: 8, 8>}, {transform_indices = @transform_6, window_bounds = array<i64: 8, 128>}]} {
    %c0 = arith.constant 0 : index
    %c0_0 = arith.constant 0 : index
    %0 = vector.load %arg2[%c0, %c0_0] : memref<8x128xf32, #tpu.memory_space<vmem>>, vector<8x128xf32>
    %c0_1 = arith.constant 0 : index
    %c0_2 = arith.constant 0 : index
    %1 = vector.load %arg3[%c0_1, %c0_2] : memref<8x128xf32, #tpu.memory_space<vmem>>, vector<8x128xf32>
    %c0_3 = arith.constant 0 : index
    %c0_4 = arith.constant 0 : index
    %2 = vector.load %arg5[%c0_3, %c0_4] : memref<8x1xf32, #tpu.memory_space<vmem>>, vector<8x1xf32>
    %3 = vector.broadcast %2 : vector<8x1xf32> to vector<8x128xf32>
    %4 = arith.mulf %3, %1 : vector<8x128xf32>
    %c0_5 = arith.constant 0 : index
    %c0_6 = arith.constant 0 : index
    %5 = vector.load %arg4[%c0_5, %c0_6] : memref<8x1xf32, #tpu.memory_space<vmem>>, vector<8x1xf32>
    %6 = vector.broadcast %5 : vector<8x1xf32> to vector<8x128xf32>
    %7 = arith.mulf %6, %0 : vector<8x128xf32>
    %8 = arith.addf %4, %7 : vector<8x128xf32>
    %c0_7 = arith.constant 0 : index
    %c0_8 = arith.constant 0 : index
    %9 = vector.load %arg7[%c0_7, %c0_8] : memref<8x8xf32, #tpu.memory_space<vmem>>, vector<8x8xf32>
    %cst = arith.constant dense<0.000000e+00> : vector<8x128xf32>
    %10 = tpu.matmul %9, %8, %cst {dimension_numbers = #tpu.dot_dimension_numbers<[1], [0], [0], [1], [0, 0, 1, 1], [], []>} : vector<8x8xf32>, vector<8x128xf32>, vector<8x128xf32> -> vector<8x128xf32>
    %c0_9 = arith.constant 0 : index
    %c0_10 = arith.constant 0 : index
    %11 = vector.load %arg6[%c0_9, %c0_10] : memref<8x1xf32, #tpu.memory_space<vmem>>, vector<8x1xf32>
    %12 = vector.broadcast %11 : vector<8x1xf32> to vector<8x128xf32>
    %13 = arith.subf %12, %1 : vector<8x128xf32>
    %14 = arith.addf %10, %13 : vector<8x128xf32>
    %15 = arith.mulf %14, %14 : vector<8x128xf32>
    %c0_i32 = arith.constant 0 : i32
    %16 = arith.cmpi eq, %arg1, %c0_i32 : i32
    %17 = arith.extui %16 : i1 to i32
    %c0_i32_11 = arith.constant 0 : i32
    %18 = arith.cmpi ne, %17, %c0_i32_11 : i32
    scf.if %18 {
      %cst_16 = arith.constant 0.000000e+00 : f32
      %22 = vector.broadcast %cst_16 : f32 to vector<8x128xf32>
      %c0_17 = arith.constant 0 : index
      %c0_18 = arith.constant 0 : index
      %23 = vector.load %arg8[%c0_17, %c0_18] : memref<8x128xf32, #tpu.memory_space<vmem>>, vector<8x128xf32>
      tpu.vector_store %arg8[%c0_17, %c0_18], %22 {strides = array<i32>} : memref<8x128xf32, #tpu.memory_space<vmem>>, vector<8x128xf32>,
    } else {
    }
    %c0_12 = arith.constant 0 : index
    %c0_13 = arith.constant 0 : index
    %19 = vector.load %arg8[%c0_12, %c0_13] : memref<8x128xf32, #tpu.memory_space<vmem>>, vector<8x128xf32>
    %20 = arith.addf %19, %15 : vector<8x128xf32>
    %c0_14 = arith.constant 0 : index
    %c0_15 = arith.constant 0 : index
    %21 = vector.load %arg8[%c0_14, %c0_15] : memref<8x128xf32, #tpu.memory_space<vmem>>, vector<8x128xf32>
    tpu.vector_store %arg8[%c0_14, %c0_15], %20 {strides = array<i32>} : memref<8x128xf32, #tpu.memory_space<vmem>>, vector<8x128xf32>,
    return
  }
  func.func @transform_0(%arg0: i32, %arg1: i32) -> (i32, i32) {
    %c0_i32 = arith.constant 0 : i32
    return %arg0, %arg1 : i32, i32
  }
  func.func @transform_1(%arg0: i32, %arg1: i32) -> (i32, i32) {
    %c0_i32 = arith.constant 0 : i32
    return %arg0, %arg1 : i32, i32
  }
  func.func @transform_2(%arg0: i32, %arg1: i32) -> (i32, i32) {
    %c0_i32 = arith.constant 0 : i32
    %c0_i32_0 = arith.constant 0 : i32
    return %arg0, %c0_i32 : i32, i32
  }
  func.func @transform_3(%arg0: i32, %arg1: i32) -> (i32, i32) {
    %c0_i32 = arith.constant 0 : i32
    %c0_i32_0 = arith.constant 0 : i32
    return %arg0, %c0_i32 : i32, i32
  }
  func.func @transform_4(%arg0: i32, %arg1: i32) -> (i32, i32) {
    %c0_i32 = arith.constant 0 : i32
    %c0_i32_0 = arith.constant 0 : i32
    return %arg0, %c0_i32 : i32, i32
  }
  func.func @transform_5(%arg0: i32, %arg1: i32) -> (i32, i32) {
    %c0_i32 = arith.constant 0 : i32
    %c0_i32_0 = arith.constant 0 : i32
    %c0_i32_1 = arith.constant 0 : i32
    return %c0_i32, %c0_i32_0 : i32, i32
  }
  func.func @transform_6(%arg0: i32, %arg1: i32) -> (i32, i32) {
    %c0_i32 = arith.constant 0 : i32
    %c0_i32_0 = arith.constant 0 : i32
    return %arg0, %c0_i32 : i32, i32
  }
}

</mosaic_0001>

<bundles_post_ra>
// kernel: tpu_custom_call.1
= control target key start
LH: loop header
LB: loop body
LE: loop exit
PB: predicated region body
PF: predicated region fallthrough
CT: control target
= control target key end

     0   :  { %v182_v1 = vmov 0   ;;  %s242_s0 = inlined_call_operand.vmem [shape: f32[8,128], index: 0, kind: input, shape index: {}]   ;;  %s243_s1 = inlined_call_operand.vmem [shape: f32[8,128], index: 1, kind: input, shape index: {}]   ;;  %s244_s2 = inlined_call_operand.vmem [shape: f32[8,1], index: 2, kind: input, shape index: {}]   ;;  %s245_s3 = inlined_call_operand.vmem [shape: f32[8,1], index: 3, kind: input, shape index: {}]   ;;  %s246_s4 = inlined_call_operand.vmem [shape: f32[8,1], index: 4, kind: input, shape index: {}]   ;;  %s247_s5 = inlined_call_operand.vmem [shape: f32[8,8], index: 5, kind: input, shape index: {}]   ;;  %s248_s6 = inlined_call_operand.hbm [shape: f32[8,128], index: 6, kind: output, shape index: {}]  }
   0x1   :  { %v26_v0 = vld [vmem:[%s245_s3] sm:$0xff]  ;;  %158 = vset.pattern.permute.xlu0 %v182_v1  ;;  %159 = vset.pattern.permute.xlu1 %v182_v1 }
   0x2   :  { %11 = vsyncpa [#allocation3], 0  ;;  %29 = vperm.xlu0 %158, %v26_v0   ;;  %v33_v2 = vld [vmem:[%s244_s2] sm:$0xff]  ;;  %v183_v3 = vmov 0.0   ;;  %vm184_vm0 = vmmov 0   ;;  %vm49_vm1 = vcmask 64512  }
   0x3   :  { %149 = vmatprep.subr.mxu0 %v183_v3  ;;  %151 = vmatprep.mubr.msk.f32.mxu0 %vm184_vm0, %v183_v3  ;;  %v42_v4 = vld [vmem:[%s246_s4] sm:$0xff] }
   0x4   :  { %45 = vperm.xlu1 %159, %v42_v4   ;;  %v25_v6 = vld [vmem:[%s243_s1] sm:$0xff]  ;;  %s185_s1 = smov [#allocation2]  }
   0x5   :  { %v24_v7 = vld [vmem:[%s242_s0] sm:$0xff]  ;;  %s138_s4 = sshll.u32 %s185_s1, 4  ;;  %s139_s4 = int_to_ptr.vmem [resolvable:$true] %s138_s4 }
   0x6   :  { %36 = vperm.xlu0 %158, %v33_v2   ;;  %v41_v12 = vld [vmem:[%s247_s5] sm:$0xff]  ;;  %s160_s0 = scalar_lea.vmem %s139_s4, 128  ;;  %p165_p1 = scmp.lt.s32.totalorder %s139_s4, %s139_s4 }
   0x7   :  { %p161_p0 = scmp.ne.s32.totalorder %s139_s4, %s160_s0  ;;  %p166_p2 = scmp.lt.s32.totalorder %s160_s0, %s160_s0 }
   0x9   :  { %p167_p3 = por %p166_p2, %p165_p1 }
   0xb   :  { %p168_p4 = pnand %p167_p3, %p161_p0 }
  0x7d   :  { %v30_v5 = vpop.permute.xlu0 %29 }
  0x7e   :  { %v32_v9 = vmul.f32 %v30_v5, %v25_v6 }
  0x7f   :  { %v46_v13 = vpop.permute.xlu1 %45 }
  0x80   :  { %v48_v14 = vsub.f32 %v46_v13, %v25_v6 }
  0x81   :  { %v37_v8 = vpop.permute.xlu0 %36 }
  0x82   :  { %v39_v10 = vmul.f32 %v37_v8, %v24_v7 }
  0x84   :  { %v40_v11 = vadd.f32 %v39_v10, %v32_v9 }
  0x86   :  { %150 = vmatpush3.msra.mxu0 %v40_v11 }
  0x87   :  { %152 = vmatmul.mubr.msk.f32.vlgmr.msra.gmra.mxu0 %vm49_vm1, %v41_v12 }
 0x147   :  { %v119_v15 = vpop.f32.mrf.mxu0 }
 0x148   :  { %v120_v16 = vadd.f32 %v119_v15, %v48_v14 }
 0x149   :  { %v153_v17 = vpop.f32.mrf.mxu0 }
 0x14a   :  { %v123_v18 = vmul.f32 %v120_v16, %v120_v16 }
 0x14c   :  { %131 = vst [vmem:[#allocation2] sm:$0xff] %v123_v18 }
 0x14d   :  { %171 = shalt.err (!%p168_p4)
}
 0x14e   :  { %141 = dma.vmem_to_hbm [thread:$0]  %s139_s4, 128, %s248_s6, [#allocation3]  }
 0x14f   :  { %180 = dma.done.wait [#allocation3], 128  }
 0x150   :  { %181 = vsyncadd [#allocation3], 4294967168 }
 0x151   :  { %145 = vsyncpa [#allocation3], 1 }

</bundles_post_ra>
